<compile_context>
chip_gen: v6e
topology: v6e:2x2x1
jax: 0.10.0
libtpu: 0.0.40
codegen_flags: <defaults>
</compile_context>

<pallas_src>
import jax
import jax.numpy as jnp
from jax.experimental import pallas as pl
from jax.experimental.pallas import tpu as pltpu


def mdn_kernel(x_ref, mask_ref, noise_ref, log_alpha_ref, nondiag_ref,
               wh_ref, bh_ref, wheads_ref, bheads_ref, out_ref):
    tb, n_in, _ = noise_ref.shape
    n_g3 = wheads_ref.shape[1]
    n_g = n_g3 // 3

    # ---- GumbelAdjacency.forward (tau=1, drawhard=True) -----------------
    # sigmoid(z) > 0.5  <=>  z > 0 : no transcendental needed; fold the
    # (ones - eye) mask into the select.
    z = log_alpha_ref[...][None, :, :] + noise_ref[...]          # (tb, n_in, n_in)
    parents = jnp.where(z > 0.0, nondiag_ref[...][None, :, :], 0.0)

    # ---- einsum('ij,ij,ijk->ijk', x, mask, parents) ----------------------
    # x/mask arrive sublane-major (tb, n_in, 1): pure broadcast multiply.
    xm = x_ref[...] * mask_ref[...]                               # (tb, n_in, 1)
    xp = parents * xm                                             # (tb, n_in, n_in)

    # ---- z_h = tanh(Linear(n_in, n_hidden)) : one stacked matmul ---------
    xp2 = xp.reshape(tb * n_in, n_in)                             # stack samples
    z_h = jnp.tanh(
        jnp.dot(xp2, wh_ref[...], preferred_element_type=jnp.float32)
        + bh_ref[...])                                            # (tb*n_in, n_hidden)

    # ---- fused pi|mu|sigma heads: one (n_hidden, 3*n_g) matmul -----------
    heads = (jnp.dot(z_h, wheads_ref[...], preferred_element_type=jnp.float32)
             + bheads_ref[...])                                   # (tb*n_in, 3*n_g)

    # pi = softmax(head_pi)
    logits = heads[:, :n_g]
    logits = logits - jnp.max(logits, axis=-1, keepdims=True)
    ex = jnp.exp(logits)
    pi = ex * pl.reciprocal(jnp.sum(ex, axis=-1, keepdims=True), approx=True)
    # mu = head_mu ; sigma = exp(head_sigma)
    mu = heads[:, n_g:2 * n_g]
    sigma = jnp.exp(heads[:, 2 * n_g:])

    # single lane-dense packed writeback (split in the wrapper)
    out_ref[...] = jnp.concatenate([pi, mu, sigma], axis=-1).reshape(tb, n_in, n_g3)


def _pick_tile_b(bs, n_in, target_rows=256, vmem_budget_bytes=8 << 20):
    """Largest divisor of bs s.t. the noise tile stays well under VMEM budget,
    stopping once TILE_B*n_in reaches the MXU row target; keeps >= 2 grid
    blocks when possible so v7x can shard the batch axis across both cores."""
    divisors = [t for t in range(1, bs + 1) if bs % t == 0]
    if len(divisors) > 1:
        divisors = divisors[:-1]          # keep at least 2 grid steps
    tile_b = 1
    for t in divisors:
        if t * n_in * n_in * 4 > vmem_budget_bytes:   # one noise buffer (x2 dbl-buf)
            break
        tile_b = t
        if t * n_in >= target_rows:
            break
    return tile_b


def mdn_forward(x, mask, noise, params, *, tile_b=None):
    bs, n_in = x.shape
    n_hidden = params["wh"].shape[1]
    n_g = params["wpi"].shape[1]

    if tile_b is None:
        tile_b = _pick_tile_b(bs, n_in)
    assert bs % tile_b == 0, "batch must be divisible by the batch tile"
    num_blocks = bs // tile_b

    # Fuse the three head linears into a single (n_hidden, 3*n_g) matmul.
    w_heads = jnp.concatenate([params["wpi"], params["wmu"], params["wsg"]], axis=1)
    b_heads = jnp.concatenate([params["bpi"], params["bmu"], params["bsg"]], axis=1)

    # Sublane-major x / mask: (bs, n_in, 1).
    x3 = x[:, :, None]
    m3 = mask[:, :, None]

    full2d = lambda shape: pl.BlockSpec(shape, lambda b: (0, 0))
    per_b3 = lambda shape: pl.BlockSpec(shape, lambda b: (b, 0, 0))

    grid_spec = pltpu.PrefetchScalarGridSpec(
        num_scalar_prefetch=0,
        grid=(num_blocks,),
        in_specs=[
            per_b3((tile_b, n_in, 1)),        # x
            per_b3((tile_b, n_in, 1)),        # mask
            per_b3((tile_b, n_in, n_in)),     # logistic noise
            full2d((n_in, n_in)),             # log_alpha
            full2d((n_in, n_in)),             # ones - eye
            full2d((n_in, n_hidden)),         # W_h^T
            full2d((1, n_hidden)),            # b_h
            full2d((n_hidden, 3 * n_g)),      # fused head weights (pi|mu|sigma)
            full2d((1, 3 * n_g)),             # fused head bias
        ],
        out_specs=per_b3((tile_b, n_in, 3 * n_g)),
    )

    packed = pl.pallas_call(
        mdn_kernel,
        grid_spec=grid_spec,
        out_shape=jax.ShapeDtypeStruct((bs, n_in, 3 * n_g), jnp.float32),
        compiler_params=pltpu.CompilerParams(
            dimension_semantics=("parallel",)),
    )(x3, m3, noise,
      params["log_alpha"], params["nondiag"],
      params["wh"], params["bh"], w_heads, b_heads)

    pi = packed[..., :n_g]
    mu = packed[..., n_g:2 * n_g]
    sigma = packed[..., 2 * n_g:]
    return pi, mu, sigma


def init_params(key, n_in, n_hidden, n_g):
    """Deterministic parameter init mimicking PyTorch Linear defaults."""
    ks = jax.random.split(key, 8)

    def linear(kw, kb, fan_in, fan_out):
        bound = 1.0 / jnp.sqrt(fan_in)
        w = jax.random.uniform(kw, (fan_out, fan_in), jnp.float32, -bound, bound)
        b = jax.random.uniform(kb, (fan_out,), jnp.float32, -bound, bound)
        return w.T, b.reshape(1, fan_out)      # pass W^T and 2-D bias

    wh, bh = linear(ks[0], ks[1], n_in, n_hidden)
    wpi, bpi = linear(ks[2], ks[3], n_hidden, n_g)
    wmu, bmu = linear(ks[4], ks[5], n_hidden, n_g)
    wsg, bsg = linear(ks[6], ks[7], n_hidden, n_g)

    # TODO(synk): MDN calls GumbelAdjacency(n_in) without start_adj_entry
    # (would raise in PyTorch); we use the natural constant-0 init here.
    log_alpha = jnp.zeros((n_in, n_in), jnp.float32)
    nondiag = jnp.ones((n_in, n_in), jnp.float32) - jnp.eye(n_in, dtype=jnp.float32)

    return dict(log_alpha=log_alpha, nondiag=nondiag,
                wh=wh, bh=bh, wpi=wpi, bpi=bpi,
                wmu=wmu, bmu=bmu, wsg=wsg, bsg=bsg)


def mdn_reference(x, mask, noise, params):
    """Pure-JAX reference matching the PyTorch forward (hard Gumbel sample)."""
    hp = jax.lax.Precision.HIGHEST
    y_soft = jax.nn.sigmoid(params["log_alpha"][None] + noise)
    parents = jnp.where(y_soft > 0.5, 1.0, 0.0) * params["nondiag"][None]
    xp = jnp.einsum('ij,ij,ijk->ijk', x, mask, parents)
    z_h = jnp.tanh(jnp.einsum('bjk,kh->bjh', xp, params["wh"], precision=hp)
                   + params["bh"][0])
    pi = jax.nn.softmax(jnp.einsum('bjh,hg->bjg', z_h, params["wpi"], precision=hp)
                        + params["bpi"][0], axis=-1)
    mu = jnp.einsum('bjh,hg->bjg', z_h, params["wmu"], precision=hp) + params["bmu"][0]
    sigma = jnp.exp(jnp.einsum('bjh,hg->bjg', z_h, params["wsg"], precision=hp)
                    + params["bsg"][0])
    return pi, mu, sigma


if __name__ == "__main__":
    bs, n_in, n_hidden, n_g = 8, 8, 32, 4

    key = jax.random.PRNGKey(0)
    k_param, k_x, k_noise = jax.random.split(key, 3)

    params = init_params(k_param, n_in, n_hidden, n_g)
    x = jax.random.normal(k_x, (bs, n_in), jnp.float32)
    mask = jnp.ones((bs, n_in), jnp.float32)

    # logistic noise: log(u) - log(1 - u), u ~ U(0,1)
    u = jax.random.uniform(k_noise, (bs, n_in, n_in), jnp.float32,
                           minval=1e-6, maxval=1.0 - 1e-6)
    noise = jnp.log(u) - jnp.log(1.0 - u)

    pi, mu, sigma = mdn_forward(x, mask, noise, params)
    jax.block_until_ready((pi, mu, sigma))

    assert pi.shape == (bs, n_in, n_g)
    assert mu.shape == (bs, n_in, n_g)
    assert sigma.shape == (bs, n_in, n_g)

    pi_r, mu_r, sig_r = mdn_reference(x, mask, noise, params)
    tol = dict(atol=5e-3, rtol=5e-3)
    assert bool(jnp.allclose(pi, pi_r, **tol)), "pi mismatch vs reference"
    assert bool(jnp.allclose(mu, mu_r, **tol)), "mu mismatch vs reference"
    assert bool(jnp.allclose(sigma, sig_r, **tol)), "sigma mismatch vs reference"

    print("KERNEL_OK")
</pallas_src>

<mosaic_0001>
module attributes {stable_mosaic.version = 11 : i64} {
  func.func @mdn_kernel(%arg0: i32, %arg1: memref<4x8x1xf32, #tpu.memory_space<vmem>>, %arg2: memref<4x8x1xf32, #tpu.memory_space<vmem>>, %arg3: memref<4x8x8xf32, #tpu.memory_space<vmem>>, %arg4: memref<8x8xf32, #tpu.memory_space<vmem>>, %arg5: memref<8x8xf32, #tpu.memory_space<vmem>>, %arg6: memref<8x32xf32, #tpu.memory_space<vmem>>, %arg7: memref<1x32xf32, #tpu.memory_space<vmem>>, %arg8: memref<32x12xf32, #tpu.memory_space<vmem>>, %arg9: memref<1x12xf32, #tpu.memory_space<vmem>>, %arg10: memref<4x8x12xf32, #tpu.memory_space<vmem>>) attributes {dimension_semantics = [#tpu.dimension_semantics<parallel>], iteration_bounds = array<i64: 2>, scalar_prefetch = 0 : i64, scratch_operands = 0 : i64, tpu.core_type = #tpu.core_type<tc>, window_params = [{transform_indices = @transform_0, window_bounds = array<i64: 4, 8, 1>}, {transform_indices = @transform_1, window_bounds = array<i64: 4, 8, 1>}, {transform_indices = @transform_2, window_bounds = array<i64: 4, 8, 8>}, {pipeline_mode = #tpu.pipeline_mode<synchronous>, transform_indices = @transform_3, window_bounds = array<i64: 8, 8>}, {pipeline_mode = #tpu.pipeline_mode<synchronous>, transform_indices = @transform_4, window_bounds = array<i64: 8, 8>}, {pipeline_mode = #tpu.pipeline_mode<synchronous>, transform_indices = @transform_5, window_bounds = array<i64: 8, 32>}, {pipeline_mode = #tpu.pipeline_mode<synchronous>, transform_indices = @transform_6, window_bounds = array<i64: 1, 32>}, {pipeline_mode = #tpu.pipeline_mode<synchronous>, transform_indices = @transform_7, window_bounds = array<i64: 32, 12>}, {pipeline_mode = #tpu.pipeline_mode<synchronous>, transform_indices = @transform_8, window_bounds = array<i64: 1, 12>}, {transform_indices = @transform_9, window_bounds = array<i64: 4, 8, 12>}]} {
    %c0 = arith.constant 0 : index
    %c0_0 = arith.constant 0 : index
    %0 = vector.load %arg4[%c0, %c0_0] : memref<8x8xf32, #tpu.memory_space<vmem>>, vector<8x8xf32>
    %1 = vector.shape_cast %0 : vector<8x8xf32> to vector<1x8x8xf32>
    %c0_1 = arith.constant 0 : index
    %c0_2 = arith.constant 0 : index
    %c0_3 = arith.constant 0 : index
    %2 = vector.load %arg3[%c0_1, %c0_2, %c0_3] : memref<4x8x8xf32, #tpu.memory_space<vmem>>, vector<4x8x8xf32>
    %3 = vector.broadcast %1 : vector<1x8x8xf32> to vector<4x8x8xf32>
    %4 = arith.addf %3, %2 : vector<4x8x8xf32>
    %cst = arith.constant 0.000000e+00 : f32
    %5 = vector.broadcast %cst : f32 to vector<4x8x8xf32>
    %6 = arith.cmpf ogt, %4, %5 : vector<4x8x8xf32>
    %c0_4 = arith.constant 0 : index
    %c0_5 = arith.constant 0 : index
    %7 = vector.load %arg5[%c0_4, %c0_5] : memref<8x8xf32, #tpu.memory_space<vmem>>, vector<8x8xf32>
    %8 = vector.shape_cast %7 : vector<8x8xf32> to vector<1x8x8xf32>
    %cst_6 = arith.constant 0.000000e+00 : f32
    %9 = vector.shape_cast %8 : vector<1x8x8xf32> to vector<1x8x8xf32>
    %10 = vector.broadcast %9 : vector<1x8x8xf32> to vector<4x8x8xf32>
    %11 = vector.broadcast %cst_6 : f32 to vector<4x8x8xf32>
    %12 = arith.select %6, %10, %11 : vector<4x8x8xi1>, vector<4x8x8xf32>
    %c0_7 = arith.constant 0 : index
    %c0_8 = arith.constant 0 : index
    %c0_9 = arith.constant 0 : index
    %13 = vector.load %arg1[%c0_7, %c0_8, %c0_9] : memref<4x8x1xf32, #tpu.memory_space<vmem>>, vector<4x8x1xf32>
    %c0_10 = arith.constant 0 : index
    %c0_11 = arith.constant 0 : index
    %c0_12 = arith.constant 0 : index
    %14 = vector.load %arg2[%c0_10, %c0_11, %c0_12] : memref<4x8x1xf32, #tpu.memory_space<vmem>>, vector<4x8x1xf32>
    %15 = arith.mulf %13, %14 : vector<4x8x1xf32>
    %16 = vector.broadcast %15 : vector<4x8x1xf32> to vector<4x8x8xf32>
    %17 = arith.mulf %12, %16 : vector<4x8x8xf32>
    %18 = vector.shape_cast %17 : vector<4x8x8xf32> to vector<32x8xf32>
    %c0_13 = arith.constant 0 : index
    %c0_14 = arith.constant 0 : index
    %19 = vector.load %arg6[%c0_13, %c0_14] : memref<8x32xf32, #tpu.memory_space<vmem>>, vector<8x32xf32>
    %cst_15 = arith.constant dense<0.000000e+00> : vector<32x32xf32>
    %20 = tpu.matmul %18, %19, %cst_15 {dimension_numbers = #tpu.dot_dimension_numbers<[1], [0], [0], [1], [0, 0, 1, 1], [], []>} : vector<32x8xf32>, vector<8x32xf32>, vector<32x32xf32> -> vector<32x32xf32>
    %c0_16 = arith.constant 0 : index
    %c0_17 = arith.constant 0 : index
    %21 = vector.load %arg7[%c0_16, %c0_17] : memref<1x32xf32, #tpu.memory_space<vmem>>, vector<1x32xf32>
    %22 = vector.broadcast %21 : vector<1x32xf32> to vector<32x32xf32>
    %23 = arith.addf %20, %22 : vector<32x32xf32>
    %24 = math.tanh %23 : vector<32x32xf32>
    %c0_18 = arith.constant 0 : index
    %c0_19 = arith.constant 0 : index
    %25 = vector.load %arg8[%c0_18, %c0_19] : memref<32x12xf32, #tpu.memory_space<vmem>>, vector<32x12xf32>
    %cst_20 = arith.constant dense<0.000000e+00> : vector<32x12xf32>
    %26 = tpu.matmul %24, %25, %cst_20 {dimension_numbers = #tpu.dot_dimension_numbers<[1], [0], [0], [1], [0, 0, 1, 1], [], []>} : vector<32x32xf32>, vector<32x12xf32>, vector<32x12xf32> -> vector<32x12xf32>
    %c0_21 = arith.constant 0 : index
    %c0_22 = arith.constant 0 : index
    %27 = vector.load %arg9[%c0_21, %c0_22] : memref<1x12xf32, #tpu.memory_space<vmem>>, vector<1x12xf32>
    %28 = vector.broadcast %27 : vector<1x12xf32> to vector<32x12xf32>
    %29 = arith.addf %26, %28 : vector<32x12xf32>
    %30 = vector.extract_strided_slice %29 {offsets = [0, 0], sizes = [32, 4], strides = [1, 1]} : vector<32x12xf32> to vector<32x4xf32>
    %cst_23 = arith.constant dense<0xFF800000> : vector<32xf32>
    %31 = vector.multi_reduction <maximumf>, %30, %cst_23 [1] : vector<32x4xf32> to vector<32xf32>
    %32 = vector.shape_cast %31 : vector<32xf32> to vector<32x1xf32>
    %33 = vector.broadcast %32 : vector<32x1xf32> to vector<32x4xf32>
    %34 = arith.subf %30, %33 : vector<32x4xf32>
    %35 = math.exp %34 : vector<32x4xf32>
    %cst_24 = arith.constant dense<0.000000e+00> : vector<32xf32>
    %36 = vector.multi_reduction <add>, %35, %cst_24 [1] : vector<32x4xf32> to vector<32xf32>
    %37 = vector.shape_cast %36 : vector<32xf32> to vector<32x1xf32>
    %38 = tpu.reciprocal %37 {approx = true} : vector<32x1xf32> -> vector<32x1xf32>
    %39 = vector.broadcast %38 : vector<32x1xf32> to vector<32x4xf32>
    %40 = arith.mulf %35, %39 : vector<32x4xf32>
    %41 = vector.extract_strided_slice %29 {offsets = [0, 4], sizes = [32, 4], strides = [1, 1]} : vector<32x12xf32> to vector<32x4xf32>
    %42 = vector.extract_strided_slice %29 {offsets = [0, 8], sizes = [32, 4], strides = [1, 1]} : vector<32x12xf32> to vector<32x4xf32>
    %43 = math.exp %42 : vector<32x4xf32>
    %44 = tpu.concatenate %40, %41, %43 in 1 : vector<32x4xf32>, vector<32x4xf32>, vector<32x4xf32> -> vector<32x12xf32>
    %45 = vector.shape_cast %44 : vector<32x12xf32> to vector<4x8x12xf32>
    %c0_25 = arith.constant 0 : index
    %c0_26 = arith.constant 0 : index
    %c0_27 = arith.constant 0 : index
    %46 = vector.load %arg10[%c0_25, %c0_26, %c0_27] : memref<4x8x12xf32, #tpu.memory_space<vmem>>, vector<4x8x12xf32>
    tpu.vector_store %arg10[%c0_25, %c0_26, %c0_27], %45 {strides = array<i32>} : memref<4x8x12xf32, #tpu.memory_space<vmem>>, vector<4x8x12xf32>,
    return
  }
  func.func @transform_0(%arg0: i32) -> (i32, i32, i32) {
    %c0_i32 = arith.constant 0 : i32
    %c0_i32_0 = arith.constant 0 : i32
    %c0_i32_1 = arith.constant 0 : i32
    return %arg0, %c0_i32, %c0_i32_0 : i32, i32, i32
  }
  func.func @transform_1(%arg0: i32) -> (i32, i32, i32) {
    %c0_i32 = arith.constant 0 : i32
    %c0_i32_0 = arith.constant 0 : i32
    %c0_i32_1 = arith.constant 0 : i32
    return %arg0, %c0_i32, %c0_i32_0 : i32, i32, i32
  }
  func.func @transform_2(%arg0: i32) -> (i32, i32, i32) {
    %c0_i32 = arith.constant 0 : i32
    %c0_i32_0 = arith.constant 0 : i32
    %c0_i32_1 = arith.constant 0 : i32
    return %arg0, %c0_i32, %c0_i32_0 : i32, i32, i32
  }
  func.func @transform_3(%arg0: i32) -> (i32, i32) {
    %c0_i32 = arith.constant 0 : i32
    %c0_i32_0 = arith.constant 0 : i32
    %c0_i32_1 = arith.constant 0 : i32
    return %c0_i32, %c0_i32_0 : i32, i32
  }
  func.func @transform_4(%arg0: i32) -> (i32, i32) {
    %c0_i32 = arith.constant 0 : i32
    %c0_i32_0 = arith.constant 0 : i32
    %c0_i32_1 = arith.constant 0 : i32
    return %c0_i32, %c0_i32_0 : i32, i32
  }
  func.func @transform_5(%arg0: i32) -> (i32, i32) {
    %c0_i32 = arith.constant 0 : i32
    %c0_i32_0 = arith.constant 0 : i32
    %c0_i32_1 = arith.constant 0 : i32
    return %c0_i32, %c0_i32_0 : i32, i32
  }
  func.func @transform_6(%arg0: i32) -> (i32, i32) {
    %c0_i32 = arith.constant 0 : i32
    %c0_i32_0 = arith.constant 0 : i32
    %c0_i32_1 = arith.constant 0 : i32
    return %c0_i32, %c0_i32_0 : i32, i32
  }
  func.func @transform_7(%arg0: i32) -> (i32, i32) {
    %c0_i32 = arith.constant 0 : i32
    %c0_i32_0 = arith.constant 0 : i32
    %c0_i32_1 = arith.constant 0 : i32
    return %c0_i32, %c0_i32_0 : i32, i32
  }
  func.func @transform_8(%arg0: i32) -> (i32, i32) {
    %c0_i32 = arith.constant 0 : i32
    %c0_i32_0 = arith.constant 0 : i32
    %c0_i32_1 = arith.constant 0 : i32
    return %c0_i32, %c0_i32_0 : i32, i32
  }
  func.func @transform_9(%arg0: i32) -> (i32, i32, i32) {
    %c0_i32 = arith.constant 0 : i32
    %c0_i32_0 = arith.constant 0 : i32
    %c0_i32_1 = arith.constant 0 : i32
    return %arg0, %c0_i32, %c0_i32_0 : i32, i32, i32
  }
}

</mosaic_0001>

<bundles_post_ra>
// kernel: tpu_custom_call.1
= control target key start
LH: loop header
LB: loop body
LE: loop exit
PB: predicated region body
PF: predicated region fallthrough
CT: control target
= control target key end

     0   :  { %14 = vsyncpa [#allocation3], 0  ;;  %s1265_s0 = inlined_call_operand.vmem [shape: f32[8,8,1], index: 0, kind: input, shape index: {}]   ;;  %s1266_s1 = inlined_call_operand.vmem [shape: f32[8,8,1], index: 1, kind: input, shape index: {}]   ;;  %s1267_s2 = inlined_call_operand.vmem [shape: f32[8,8,8], index: 2, kind: input, shape index: {}]   ;;  %s1268_s3 = inlined_call_operand.vmem [shape: f32[8,8], index: 3, kind: input, shape index: {}]   ;;  %s1269_s4 = inlined_call_operand.vmem [shape: f32[8,8], index: 4, kind: input, shape index: {}]   ;;  %s1270_s5 = inlined_call_operand.vmem [shape: f32[8,32], index: 5, kind: input, shape index: {}]   ;;  %s1271_s6 = inlined_call_operand.vmem [shape: f32[1,32], index: 6, kind: input, shape index: {}]   ;;  %s1272_s7 = inlined_call_operand.vmem [shape: f32[32,12], index: 7, kind: input, shape index: {}]   ;;  %s1273_s8 = inlined_call_operand.vmem [shape: f32[1,12], index: 8, kind: input, shape index: {}]   ;;  %s1274_s9 = inlined_call_operand.hbm [shape: f32[8,8,12], index: 9, kind: output, shape index: {}]  }
   0x1   :  { %16 = vsyncpa [#allocation3 + $0x1], 0  ;;  %s1079_s30 = smov 0   ;;  %s1081_s10 = smov 0  }
   0x2   :  { %s1083_s11 = smov 0   ;;  %s1085_s12 = smov 0  }
   0x3 LB: > { %s1100_s13 = sadd.s32 4294967295, %s1023_s12   ;;  %s817_s14 = sadd.s32 4294967294, %s1023_s12   ;;  %s1023_s12 = sphi %s1085_s12, %s1280_s12   ;;  %s1019_s11 = sphi %s1083_s11, %s1279_s11   ;;  %s1015_s10 = sphi %s1081_s10, %s1278_s10   ;;  %s1011_s30 = sphi %s1079_s30, %s1277_s30  }
   0x4   : > { %s1104_s15 = sadd.s32 1, %s1023_s12   ;;  %s233_s16 = sadd.s32 1, %s1019_s11 }
   0x5   : > { %s230_s17 = ssub.s32 %s1023_s12, %s1104_s15  ;;  %p243_p0 = scmp.ne.s32.totalorder %s1019_s11, %s1015_s10 }
   0x6   : > { %p231_p1 = scmp.eq.s32.totalorder %s230_s17, 0  ;;  %p244_p2 = scmp.eq.s32.totalorder %s1100_s13, 1 }
   0x7   : > { %p249_p3 = scmp.ne.s32.totalorder %s1015_s10, %s1011_s30  ;;  %p250_p4 = scmp.eq.s32.totalorder %s817_s14, 1 }
   0x8   : > { %s1115_s18 = scalar_select %p231_p1, %s1019_s11, %s233_s16  }
   0x9   : > { %p1117_p5 = por %p244_p2, %p243_p0  ;;  %p1121_p6 = por %p250_p4, %p249_p3 }
   0xa   : > { %p820_p7 = scmp.ge.s32.totalorder %s1023_s12, 1  ;;  %p313_p8 = scmp.lt.s32.totalorder %s1023_s12, 3 }
   0xc   : > { %p314_p9 = pnand %p820_p7, %p313_p8 }
   0xd   : > { %s822_s21 = sshll.u32 (!%p314_p9), %s1100_s13, 2  ;;  %s843_s29 = sshll.u32 (!%p314_p9), %s1100_s13, 9 }
   0xe   : > { %317 = sbr.rel (%p314_p9) target bundleno = 901 (0x385), region = 56  ;;  %p360_p10 = scmp.lt.s32.totalorder (!%p314_p9), %s822_s21, 7 }
   0xf   : > { %s1026_s24 = smov (!%p314_p9), [#allocation2]  }
  0x13   : > { %v1025_v0 = vmov 0   ;;  %s1282_s21 = smov (!%p360_p10, %s822_s21), 7  ;;  %v432_v13 = vld [vmem:[%s1270_s5] sm:$0xff]  ;;  %vm440_vm3 = vcmask 64512   ;;  %v545_v36 = vld [vmem:[%s1272_s7 + $0x18] sm:$0xff]  ;;  %v544_v37 = vld [vmem:[%s1272_s7 + $0x10] sm:$0xff] }
  0x14   : > { %930 = vset.pattern.permute.xlu1 %v1025_v0  ;;  %929 = vset.pattern.permute.xlu0 %v1025_v0  ;;  %s823_s22 = sshll.u32 %s1282_s21, 3  ;;  %v378_v14 = vld [vmem:[%s1268_s3] sm:$0xff]  ;;  %v543_v38 = vld [vmem:[%s1272_s7 + $0x8] sm:$0xff]  ;;  %vm553_vm5 = vcmask 261120   ;;  %vm651_vm6 = vcmask 31744   ;;  %vm712_vm7 = vcmask 97280  }
  0x15   : > { %s363_s25 = scalar_lea.vmem %s1265_s0, %s823_s22  ;;  %s369_s28 = scalar_lea.vmem %s1266_s1, %s823_s22  ;;  %857 = vmatprep.subr.mxu0 %v432_v13  ;;  %v391_v20 = vld [vmem:[%s1269_s4] sm:$0xff]  ;;  %879 = vmatprep.subr.mxu1 %v545_v36 }
  0x16   : > { %v398_v1 = vld [vmem:[%s363_s25 + $0x10] sm:$0xff]  ;;  %v396_v3 = vld [vmem:[%s363_s25] sm:$0xff]  ;;  %v399_v6 = vld [vmem:[%s363_s25 + $0x18] sm:$0xff]  ;;  %858 = vmatpush3.msra.mxu0 %v432_v13  ;;  %s375_s21 = scalar_lea.vmem %s1267_s2, %s823_s22  ;;  %883 = vmatpush3.msra.mxu1 %v545_v36  ;;  %s356_s22 = sand.u32 1, %s1015_s10  }
  0x17   : > { %v402_v2 = vld [vmem:[%s369_s28 + $0x10] sm:$0xff]  ;;  %v400_v5 = vld [vmem:[%s369_s28] sm:$0xff]  ;;  %v403_v7 = vld [vmem:[%s369_s28 + $0x18] sm:$0xff]  ;;  %865 = vmatprep.subr.mxu0 %v545_v36  ;;  %880 = vmatprep.subr.mxu1 %v544_v37  ;;  %s821_s27 = sshll.u32 %s356_s22, 5  ;;  %s1225_s13 = scalar_lea.sflag [#allocation3], %s356_s22 }
  0x18   : > { %v406_v4 = vmul.f32 %v402_v2, %v398_v1  ;;  %v404_v8 = vmul.f32 %v400_v5, %v396_v3  ;;  %v397_v9 = vld [vmem:[%s363_s25 + $0x8] sm:$0xff]  ;;  %v407_v11 = vmul.f32 %v403_v7, %v399_v6  ;;  %v379_v15 = vld [vmem:[%s375_s21] sm:$0xff]  ;;  %v381_v16 = vld [vmem:[%s375_s21 + $0x10] sm:$0xff]  ;;  %884 = vmatpush3.msra.mxu1 %v544_v37  ;;  %s967_s25 = sshll.u32 %s1026_s24, 4  ;;  %s968_s25 = int_to_ptr.vmem [resolvable:$false] %s967_s25 }
  0x19   : > { %v401_v10 = vld [vmem:[%s369_s28 + $0x8] sm:$0xff]  ;;  %v383_v17 = vadd.f32 %v379_v15, %v378_v14  ;;  %v385_v19 = vadd.f32 %v381_v16, %v378_v14  ;;  %v382_v22 = vld [vmem:[%s375_s21 + $0x18] sm:$0xff]  ;;  %v542_v39 = vld [vmem:[%s1272_s7] sm:$0xff]  ;;  %881 = vmatprep.subr.mxu1 %v543_v38  ;;  %s358_s28 = scalar_lea.vmem [#allocation2], %s821_s27  ;;  %s969_s26 = scalar_lea.vmem %s968_s25, 1024 }
  0x1a   : > { %420 = vperm.xlu1 %930, %v406_v4   ;;  %410 = vperm.xlu0 %929, %v404_v8   ;;  %v405_v12 = vmul.f32 %v401_v10, %v397_v9  ;;  %v380_v18 = vld [vmem:[%s375_s21 + $0x8] sm:$0xff]  ;;  %v386_v24 = vadd.f32 %v382_v22, %v378_v14  ;;  %v828_v40 = vld [vmem:[%s1271_s6] ss:$0 sm:$0xff]  ;;  %s731_s14 = sshll.u32 %s358_s28, 4  ;;  %s1215_s21 = scalar_lea.hbm %s1274_s9, %s843_s29  ;;  %s1217_s14 = int_to_ptr.vmem [resolvable:$true] %s731_s14 }
  0x1b   : > { %vm387_vm0 = vcmp.gt.f32.partialorder %v383_v17, 0.0  ;;  %v384_v21 = vadd.f32 %v380_v18, %v378_v14  ;;  %vm389_vm1 = vcmp.gt.f32.partialorder %v385_v19, 0.0  ;;  %885 = vmatpush3.msra.mxu1 %v543_v38  ;;  %v833_v53 = vld [vmem:[%s1273_s8] ss:$0 sm:$0xff]  ;;  %s963_s23 = scalar_lea.vmem %s1217_s14, 512  ;;  %p970_p0 = scmp.lt.s32.totalorder %s1217_s14, %s968_s25 }
  0x1c   : > { %v392_v23 = vsel %vm387_vm0, %v391_v20, 0.0  ;;  %v394_v27 = vsel %vm389_vm1, %v391_v20, 0.0  ;;  %vm390_vm4 = vcmp.gt.f32.partialorder %v386_v24, 0.0  ;;  %882 = vmatprep.subr.mxu1 %v542_v39  ;;  %p964_p11 = scmp.ne.s32.totalorder %s1217_s14, %s963_s23  ;;  %p971_p1 = scmp.lt.s32.totalorder %s969_s26, %s963_s23 }
  0x1d   : > { %vm388_vm2 = vcmp.gt.f32.partialorder %v384_v21, 0.0  ;;  %v395_v33 = vsel %vm390_vm4, %v391_v20, 0.0  ;;  %886 = vmatpush3.msra.mxu1 %v542_v39 }
  0x1e   : > { %425 = vperm.xlu1 %930, %v407_v11   ;;  %415 = vperm.xlu0 %929, %v405_v12   ;;  %v393_v29 = vsel %vm388_vm2, %v391_v20, 0.0  ;;  %p965_p12 = pnand %p964_p11, %p1117_p5  ;;  %p972_p2 = por %p971_p1, %p970_p0 }
  0x20   : > { %p966_p13 = pneg %p965_p12 }
  0x22   : > { %p973_p3 = pnand %p972_p2, %p966_p13 }
  0x95   : > { %v421_v25 = vpop.permute.xlu1 %420  ;;  %v411_v26 = vpop.permute.xlu0 %410 }
  0x96   : > { %v428_v28 = vmul.f32 %v411_v26, %v392_v23  ;;  %v430_v30 = vmul.f32 %v421_v25, %v394_v27 }
  0x98   : > { %859 = vmatprep.mubr.msk.f32.mxu0 %vm440_vm3, %v428_v28 }
  0x99   : > { %v416_v31 = vpop.permute.xlu0 %415  ;;  %v426_v34 = vpop.permute.xlu1 %425 }
  0x9a   : > { %v429_v32 = vmul.f32 %v416_v31, %v393_v29  ;;  %v431_v35 = vmul.f32 %v426_v34, %v395_v33 }
  0x9c   : > { %860 = vmatmul.mubr.msk.f32.vlgmr.msra.gmra.mxu0 %vm440_vm3, %v429_v32 }
  0x9d   : > { %862 = vmatprep.mubr.msk.f32.mxu0 %vm440_vm3, %v430_v30  ;;  %866 = vmatpush3.msra.mxu0 %v545_v36 }
  0x9e   : > { %867 = vmatprep.subr.mxu0 %v544_v37 }
  0x9f   : > { %868 = vmatpush3.msra.mxu0 %v544_v37 }
  0xa0   : > { %863 = vmatmul.mubr.msk.f32.gmra.mxu0 %vm440_vm3, %v431_v35  ;;  %869 = vmatprep.subr.mxu0 %v543_v38 }
  0xa1   : > { %870 = vmatpush3.msra.mxu0 %v543_v38 }
  0xa2   : > { %871 = vmatprep.subr.mxu0 %v542_v39 }
  0xa3   : > { %872 = vmatpush3.msra.mxu0 %v542_v39 }
 0x15c   : > { %v861_v41 = vpop.f32.mrf.mxu0 }
 0x15d   : > { %v525_v42 = vadd.f32 %v861_v41, %v828_v40 }
 0x15e   : > { %v519_v43 = vpop.f32.mrf.mxu0 }
 0x15f   : > { %v520_v44 = vadd.f32 %v828_v40, %v519_v43 }
 0x160   : > { %v864_v45 = vpop.f32.mrf.mxu0 }
 0x161   : > { %931 = vtanh.f32 %v520_v44  ;;  %v535_v46 = vadd.f32 %v864_v45, %v828_v40 }
 0x162   : > { %933 = vtanh.f32 %v525_v42  ;;  %v529_v47 = vpop.f32.mrf.mxu0 }
 0x163   : > { %v530_v48 = vadd.f32 %v828_v40, %v529_v47 }
 0x165   : > { %935 = vtanh.f32 %v530_v48 }
 0x166   : > { %937 = vtanh.f32 %v535_v46 }
 0x16e   : > { %v932_v49 = vpop.eup %931 }
 0x16f   : > { %v934_v50 = vpop.eup %933  ;;  %873 = vmatprep.mubr.msk.f32.mxu0 %vm553_vm5, %v932_v49 }
 0x170   : > { %874 = vmatmul.mubr.msk.f32.vlgmr.msra.gmra.mxu0 %vm553_vm5, %v934_v50 }
 0x172   : > { %v936_v51 = vpop.eup %935 }
 0x173   : > { %v938_v52 = vpop.eup %937  ;;  %876 = vmatprep.mubr.msk.f32.mxu1 %vm553_vm5, %v936_v51 }
 0x174   : > { %877 = vmatmul.mubr.msk.f32.vlgmr.msra.gmra.mxu1 %vm553_vm5, %v938_v52 }
 0x230   : > { %v875_v54 = vpop.f32.mrf.mxu0 }
 0x231   : > { %v1168_v55 = vadd.f32 %v875_v54, %v833_v53 }
 0x232   : > { %v632_v56 = vpop.f32.mrf.mxu0 }
 0x233   : > { %v1170_v57 = vadd.f32 %v833_v53, %v632_v56  ;;  %v655_v58 = vsel %vm651_vm6, %v1168_v55, -inf  ;;  %v698_v22 = vmul.f32 1.442695, %v1168_v55 }
 0x234   : > { %v878_v59 = vpop.f32.mrf.mxu1  ;;  %656 = vmax.xlane.f32.xlu1 %v655_v58 }
 0x235   : > { %v652_v60 = vsel %vm651_vm6, %v1170_v57, -inf  ;;  %v1178_v63 = vadd.f32 %v878_v59, %v833_v53  ;;  %v696_v24 = vmul.f32 1.442695, %v1170_v57 }
 0x236   : > { %v642_v61 = vpop.f32.mrf.mxu1  ;;  %653 = vmax.xlane.f32.xlu0 %v652_v60 }
 0x237   : > { %v1176_v62 = vadd.f32 %v833_v53, %v642_v61  ;;  %v661_v1 = vsel %vm651_vm6, %v1178_v63, -inf  ;;  %v702_v28 = vmul.f32 1.442695, %v1178_v63 }
 0x239   : > { %v658_v0 = vsel %vm651_vm6, %v1176_v62, -inf  ;;  %v700_v26 = vmul.f32 1.442695, %v1176_v62 }
 0x23a   : > { %659 = vmax.xlane.f32.xlu0 %v658_v0 }
 0x23e   : > { %662 = vmax.xlane.f32.xlu0 %v661_v1 }
 0x2bd   : > { %v657_v2 = vpop.xlane.xlu1 %656 }
 0x2be   : > { %v665_v3 = vsub.f32 %v1168_v55, %v657_v2 }
 0x2bf   : > { %v654_v4 = vpop.xlane.xlu0 %653 }
 0x2c0   : > { %v670_v5 = vmul.f32 1.442695, %v665_v3  ;;  %v664_v6 = vsub.f32 %v1170_v57, %v654_v4 }
 0x2c2   : > { %939 = vpow2.f32 %v670_v5  ;;  %v668_v7 = vmul.f32 1.442695, %v664_v6 }
 0x2c3   : > { %v660_v8 = vpop.xlane.xlu0 %659 }
 0x2c4   : > { %941 = vpow2.f32 %v668_v7  ;;  %v666_v9 = vsub.f32 %v1176_v62, %v660_v8 }
 0x2c6   : > { %v672_v10 = vmul.f32 1.442695, %v666_v9 }
 0x2c7   : > { %v663_v11 = vpop.xlane.xlu0 %662 }
 0x2c8   : > { %943 = vpow2.f32 %v672_v10  ;;  %v667_v12 = vsub.f32 %v1178_v63, %v663_v11 }
 0x2ca   : > { %v674_v13 = vmul.f32 1.442695, %v667_v12 }
 0x2cc   : > { %945 = vpow2.f32 %v674_v13 }
 0x2cf   : > { %v940_v14 = vpop.eup %939 }
 0x2d0   : > { %v679_v15 = vsel %vm651_vm6, %v940_v14, 0.0 }
 0x2d1   : > { %v942_v16 = vpop.eup %941  ;;  %680 = vadd.xlane.f32.xlu0 %v679_v15 }
 0x2d2   : > { %v676_v17 = vsel %vm651_vm6, %v942_v16, 0.0 }
 0x2d3   : > { %677 = vadd.xlane.f32.xlu1 %v676_v17 }
 0x2d5   : > { %v944_v18 = vpop.eup %943 }
 0x2d6   : > { %v682_v19 = vsel %vm651_vm6, %v944_v18, 0.0 }
 0x2d7   : > { %683 = vadd.xlane.f32.xlu1 %v682_v19 }
 0x2d9   : > { %v946_v20 = vpop.eup %945 }
 0x2da   : > { %v685_v21 = vsel %vm651_vm6, %v946_v20, 0.0 }
 0x2db   : > { %686 = vadd.xlane.f32.xlu0 %v685_v21 }
 0x35a   : > { %v681_v23 = vpop.xlane.xlu0 %680 }
 0x35b   : > { %947 = vrcp.f32 %v681_v23 }
 0x35c   : > { %v678_v25 = vpop.xlane.xlu1 %677 }
 0x35d   : > { %949 = vrcp.f32 %v678_v25 }
 0x35e   : > { %951 = vpow2.f32 %v698_v22 }
 0x35f   : > { %953 = vpow2.f32 %v696_v24 }
 0x360   : > { %v684_v27 = vpop.xlane.xlu1 %683 }
 0x361   : > { %955 = vrcp.f32 %v684_v27 }
 0x362   : > { %957 = vpow2.f32 %v700_v26 }
 0x364   : > { %v687_v29 = vpop.xlane.xlu0 %686 }
 0x365   : > { %959 = vrcp.f32 %v687_v29 }
 0x366   : > { %961 = vpow2.f32 %v702_v28 }
 0x368   : > { %v948_v30 = vpop.eup %947 }
 0x369   : > { %v693_v31 = vmul.f32 %v948_v30, %v940_v14 }
 0x36a   : > { %v950_v32 = vpop.eup %949 }
 0x36b   : > { %v952_v33 = vpop.eup %951  ;;  %v705_v34 = vsel %vm651_vm6, %v693_v31, %v1168_v55  ;;  %v692_v35 = vmul.f32 %v950_v32, %v942_v16 }
 0x36c   : > { %v709_v36 = vsel %vm440_vm3, %v705_v34, %v952_v33  ;;  %v954_v37 = vpop.eup %953 }
 0x36d   : > { %v704_v38 = vsel %vm651_vm6, %v692_v35, %v1170_v57  ;;  %714 = vst.msk [vmem:[%s358_s28 + $0x8] sm:$0xff] %vm712_vm7, %v709_v36 }
 0x36e   : > { %v956_v39 = vpop.eup %955  ;;  %v708_v40 = vsel %vm440_vm3, %v704_v38, %v954_v37 }
 0x36f   : > { %v694_v41 = vmul.f32 %v956_v39, %v944_v18  ;;  %713 = vst.msk [vmem:[%s358_s28] sm:$0xff] %vm712_vm7, %v708_v40  ;;  %v958_v42 = vpop.eup %957 }
 0x371   : > { %v706_v43 = vsel %vm651_vm6, %v694_v41, %v1176_v62 }
 0x372   : > { %v960_v44 = vpop.eup %959  ;;  %v710_v45 = vsel %vm440_vm3, %v706_v43, %v958_v42 }
 0x373   : > { %v695_v46 = vmul.f32 %v960_v44, %v946_v20  ;;  %715 = vst.msk [vmem:[%s358_s28 + $0x10] sm:$0xff] %vm712_vm7, %v710_v45  ;;  %v962_v47 = vpop.eup %961 }
 0x375   : > { %v707_v48 = vsel %vm651_vm6, %v695_v46, %v1178_v63 }
 0x376   : > { %v711_v49 = vsel %vm440_vm3, %v707_v48, %v962_v47 }
 0x377   : > { %716 = vst.msk [vmem:[%s358_s28 + $0x18] sm:$0xff] %vm712_vm7, %v711_v49 }
 0x378   : > { %976 = shalt.err (!%p973_p3)
}
 0x379   : > { %s977_s22 = scalar_lea.hbm %s1215_s21, 512  ;;  %s981_s29 = scalar_lea.hbm %s1274_s9, 1024 }
 0x37a   : > { %p978_p4 = scmp.ne.s32.totalorder %s1215_s21, %s977_s22  ;;  %p982_p9 = scmp.lt.s32.totalorder %s1215_s21, %s1274_s9 }
 0x37b   : > { %p983_p10 = scmp.lt.s32.totalorder %s981_s29, %s977_s22 }
 0x37c   : > { %p979_p7 = pnand %p978_p4, %p1117_p5 }
 0x37d   : > { %p984_p11 = por %p983_p10, %p982_p9 }
 0x37e   : > { %p980_p8 = pneg %p979_p7 }
 0x380   : > { %p985_p12 = pnand %p984_p11, %p980_p8 }
 0x382   : > { %988 = shalt.err (!%p985_p12)
}
 0x383   : > { %s1027_s23 = smov 128   ;;  %s1028_s24 = smov 8  }
 0x384   : > { %887 = dma.vmem_to_hbm [thread:$0]  (%p1117_p5), %s1217_s14, 512, %s1215_s21, %s1225_s13, %s1027_s23, %s1027_s23, %s1028_s24  }
 0x385 PF: > { %p893_p13 = scmp.ge.s32.totalorder %s1023_s12, 2  ;;  %s746_s25 = sand.u32 1, %s1011_s30  }
 0x386   : > { %s747_s26 = scalar_lea.sflag [#allocation3], %s746_s25 }
 0x387   : > { %p890_p0 = pnand %p893_p13, %p1121_p6 }
 0x389   : > { %p891_p1 = pneg %p890_p0 }
 0x38b   : > { %1006 = dma.done.wait (%p891_p1), %s747_s26, 512  }
 0x38c   : > { %1008 = vsyncadd (%p891_p1), %s747_s26, 4294966784  ;;  %p19_p2 = scmp.ge.s32.totalorder %s1104_s15, 4   ;;  %s1277_s30 = smov %s1015_s10 }
 0x38d   : > { %s1278_s10 = smov %s1019_s11  ;;  %s1279_s11 = smov %s1115_s18 }
 0x38e   : > { %s1280_s12 = smov %s1104_s15  ;;  %21 = sbr.rel (!%p19_p2) target bundleno = 3 (0x3), region = 97 }
 0x393   :  { %752 = vsyncpa [#allocation3], 1 }
 0x394   :  { %754 = vsyncpa [#allocation3 + $0x1], 1 }

</bundles_post_ra>
